<compile_context>
chip_gen: v5e
topology: v5e:2x2
jax: 0.10.0
libtpu: 0.0.40
codegen_flags: <defaults>
</compile_context>

<pallas_src>
import jax
import jax.numpy as jnp
from jax.experimental import pallas as pl
from jax.experimental.pallas import tpu as pltpu

# ----------------------------- problem sizes --------------------------------
S_DIM = 4        # CartPole observation dim
A_DIM = 2        # CartPole action dim
HID1 = 64        # state_fc / command_fc width
HID2 = 128       # output_fc hidden width
KIN = 8          # fused branch input width: s_dim + 2, padded to 8
RETURN_SCALE = 0.02
HORIZON_SCALE = 0.02


# ------------------------------ Pallas kernel --------------------------------
def behavior_kernel(x_ref, wbr_ref, bbr_ref, w0_ref, w12_ref, w3_ref, bp_ref, out_ref):
    # Fused branch matmul: (TB,8) @ (8,128) -> (TB,128).
    #   cols 0:64   = state branch pre-activation   (ws rows 0:4)
    #   cols 64:128 = command branch pre-activation (scale-folded wc rows 4:6)
    branch = (
        jnp.dot(x_ref[...], wbr_ref[...], preferred_element_type=jnp.float32)
        + bbr_ref[...]
    )
    s_out = jnp.tanh(branch[:, :HID1])
    c_out = jax.nn.sigmoid(branch[:, HID1:])
    emb = s_out * c_out                                           # (TB, 64)

    # output MLP head (biases packed as rows of bp_ref)
    h = jnp.maximum(
        jnp.dot(emb, w0_ref[...], preferred_element_type=jnp.float32) + bp_ref[0:1, :],
        0.0,
    )
    h = jnp.maximum(
        jnp.dot(h, w12_ref[0], preferred_element_type=jnp.float32) + bp_ref[1:2, :],
        0.0,
    )
    h = jnp.maximum(
        jnp.dot(h, w12_ref[1], preferred_element_type=jnp.float32) + bp_ref[2:3, :],
        0.0,
    )
    # lane-dense final matmul: w3 zero-padded to 128 output cols; real logits in cols 0:A_DIM
    logits = jnp.dot(h, w3_ref[...], preferred_element_type=jnp.float32) + bp_ref[3:4, :]
    out_ref[...] = logits.astype(out_ref.dtype)


# ------------------------------ packing ---------------------------------------
def _round_up(x, m):
    return ((x + m - 1) // m) * m


def pack_params(p):
    """Pre-pack raw params into the fused kernel layout (done once, outside the kernel)."""
    # fused branch weight: block-"diagonal" (8, 128); scale folded into wc rows
    wbr = jnp.zeros((KIN, 2 * HID1), jnp.float32)
    wbr = wbr.at[:S_DIM, :HID1].set(p["ws"])
    wc_scaled = p["wc"] * p["command_scale"].T                    # (2,64) row-scaled
    wbr = wbr.at[S_DIM:S_DIM + 2, HID1:].set(wc_scaled)
    bbr = jnp.concatenate([p["bs"], p["bc"]], axis=-1)            # (1, 128)

    w12 = jnp.stack([p["w1"], p["w2"]], axis=0)                   # (2, 128, 128)

    w3p = jnp.zeros((HID2, HID2), jnp.float32).at[:, :A_DIM].set(p["w3"])
    b3p = jnp.zeros((1, HID2), jnp.float32).at[:, :A_DIM].set(p["b3"])
    bp = jnp.concatenate([p["b0"], p["b1"], p["b2"], b3p], axis=0)  # (4, 128)

    return dict(wbr=wbr, bbr=bbr, w0=p["w0"], w12=w12, w3p=w3p, bp=bp)


# ------------------------------ wrapper ---------------------------------------
def behavior_forward(state, command, packed, *, max_tile=512):
    """Pallas-backed BehaviorFunction.forward(state, command) using packed params."""
    B = state.shape[0]
    TB = min(max_tile, _round_up(B, 8))       # batch tile (multiple of 8 sublanes)
    Bp = _round_up(B, TB)                     # padded batch, divisible by TB

    # fused branch input: [state | command | zero-pad] -> (Bp, 8)
    x = jnp.concatenate([state, command], axis=-1)                # (B, 6)
    x = jnp.pad(x, ((0, Bp - B), (0, KIN - x.shape[-1])))         # (Bp, 8)

    def full(a):
        # whole-array, VMEM-resident across all grid steps
        return pl.BlockSpec(a.shape, lambda i: (0,) * a.ndim)

    out = pl.pallas_call(
        behavior_kernel,
        out_shape=jax.ShapeDtypeStruct((Bp, HID2), jnp.float32),   # lane-dense output slab
        grid=(Bp // TB,),
        in_specs=[
            pl.BlockSpec((TB, KIN), lambda i: (i, 0)),             # fused input, batch-tiled
            full(packed["wbr"]),
            full(packed["bbr"]),
            full(packed["w0"]),
            full(packed["w12"]),
            full(packed["w3p"]),
            full(packed["bp"]),
        ],
        out_specs=pl.BlockSpec((TB, HID2), lambda i: (i, 0)),
        compiler_params=pltpu.CompilerParams(dimension_semantics=("parallel",)),
    )(x, packed["wbr"], packed["bbr"], packed["w0"],
      packed["w12"], packed["w3p"], packed["bp"])

    return out[:B, :A_DIM]


# ------------------------- deterministic parameter init ----------------------
def _linear_params(key, fan_in, fan_out):
    """Mimic torch.nn.Linear default init: U(-1/sqrt(fan_in), 1/sqrt(fan_in))."""
    kw, kb = jax.random.split(key)
    bound = 1.0 / jnp.sqrt(jnp.float32(fan_in))
    w = jax.random.uniform(kw, (fan_in, fan_out), jnp.float32, -bound, bound)
    b = jax.random.uniform(kb, (1, fan_out), jnp.float32, -bound, bound)
    return w, b


def init_params(seed=0):
    keys = jax.random.split(jax.random.PRNGKey(seed), 6)
    ws, bs = _linear_params(keys[0], S_DIM, HID1)
    wc, bc = _linear_params(keys[1], 2, HID1)
    w0, b0 = _linear_params(keys[2], HID1, HID2)
    w1, b1 = _linear_params(keys[3], HID2, HID2)
    w2, b2 = _linear_params(keys[4], HID2, HID2)
    w3, b3 = _linear_params(keys[5], HID2, A_DIM)
    # command_scale = [return_scale, horizon_scale], as in the UDRL script
    command_scale = jnp.array([[RETURN_SCALE, HORIZON_SCALE]], dtype=jnp.float32)
    return dict(
        command_scale=command_scale,
        ws=ws, bs=bs, wc=wc, bc=bc,
        w0=w0, b0=b0, w1=w1, b1=b1, w2=w2, b2=b2, w3=w3, b3=b3,
    )


# ----------------------------- pure-JAX reference -----------------------------
def behavior_forward_ref(state, command, p):
    s_out = jnp.tanh(state @ p["ws"] + p["bs"])
    c_out = jax.nn.sigmoid((command * p["command_scale"]) @ p["wc"] + p["bc"])
    emb = s_out * c_out
    h = jnp.maximum(emb @ p["w0"] + p["b0"], 0.0)
    h = jnp.maximum(h @ p["w1"] + p["b1"], 0.0)
    h = jnp.maximum(h @ p["w2"] + p["b2"], 0.0)
    return h @ p["w3"] + p["b3"]


# ---------------------------------- main --------------------------------------
if __name__ == "__main__":
    B = 8  # small batch

    key = jax.random.PRNGKey(0)
    k_state, k_desire, k_horizon = jax.random.split(key, 3)

    state = jax.random.normal(k_state, (B, S_DIM), dtype=jnp.float32)
    # command = cat(desire, horizon) as done in .action() before forward()
    desire = jax.random.uniform(k_desire, (B, 1), jnp.float32, 0.0, 200.0)
    horizon = jax.random.uniform(k_horizon, (B, 1), jnp.float32, 1.0, 200.0)
    command = jnp.concatenate([desire, horizon], axis=-1)  # (B, 2)

    params = init_params(seed=0)
    packed = pack_params(params)

    logits = behavior_forward(state, command, packed)
    logits = jax.block_until_ready(logits)

    ref = behavior_forward_ref(state, command, params)
    assert logits.shape == (B, A_DIM)
    assert jnp.allclose(logits, ref, atol=1e-4, rtol=1e-4), "mismatch vs reference"

    # TODO(synk): for very large training batches on v6e/v7x, cast matmul inputs
    # (activations + 128x128 weights) to bfloat16 with preferred_element_type=f32.

    print("KERNEL_OK")
</pallas_src>

<mosaic_0001>
module attributes {stable_mosaic.version = 11 : i64} {
  func.func @behavior_kernel(%arg0: i32, %arg1: memref<8x8xf32, #tpu.memory_space<vmem>>, %arg2: memref<8x128xf32, #tpu.memory_space<vmem>>, %arg3: memref<1x128xf32, #tpu.memory_space<vmem>>, %arg4: memref<64x128xf32, #tpu.memory_space<vmem>>, %arg5: memref<2x128x128xf32, #tpu.memory_space<vmem>>, %arg6: memref<128x128xf32, #tpu.memory_space<vmem>>, %arg7: memref<4x128xf32, #tpu.memory_space<vmem>>, %arg8: memref<8x128xf32, #tpu.memory_space<vmem>>) attributes {dimension_semantics = [#tpu.dimension_semantics<parallel>], iteration_bounds = array<i64: 1>, scalar_prefetch = 0 : i64, scratch_operands = 0 : i64, tpu.core_type = #tpu.core_type<tc>, window_params = [{transform_indices = @transform_0, window_bounds = array<i64: 8, 8>}, {pipeline_mode = #tpu.pipeline_mode<synchronous>, transform_indices = @transform_1, window_bounds = array<i64: 8, 128>}, {pipeline_mode = #tpu.pipeline_mode<synchronous>, transform_indices = @transform_2, window_bounds = array<i64: 1, 128>}, {pipeline_mode = #tpu.pipeline_mode<synchronous>, transform_indices = @transform_3, window_bounds = array<i64: 64, 128>}, {pipeline_mode = #tpu.pipeline_mode<synchronous>, transform_indices = @transform_4, window_bounds = array<i64: 2, 128, 128>}, {pipeline_mode = #tpu.pipeline_mode<synchronous>, transform_indices = @transform_5, window_bounds = array<i64: 128, 128>}, {pipeline_mode = #tpu.pipeline_mode<synchronous>, transform_indices = @transform_6, window_bounds = array<i64: 4, 128>}, {transform_indices = @transform_7, window_bounds = array<i64: 8, 128>}]} {
    %c0 = arith.constant 0 : index
    %c0_0 = arith.constant 0 : index
    %0 = vector.load %arg1[%c0, %c0_0] : memref<8x8xf32, #tpu.memory_space<vmem>>, vector<8x8xf32>
    %c0_1 = arith.constant 0 : index
    %c0_2 = arith.constant 0 : index
    %1 = vector.load %arg2[%c0_1, %c0_2] : memref<8x128xf32, #tpu.memory_space<vmem>>, vector<8x128xf32>
    %cst = arith.constant dense<0.000000e+00> : vector<8x128xf32>
    %2 = tpu.matmul %0, %1, %cst {dimension_numbers = #tpu.dot_dimension_numbers<[1], [0], [0], [1], [0, 0, 1, 1], [], []>} : vector<8x8xf32>, vector<8x128xf32>, vector<8x128xf32> -> vector<8x128xf32>
    %c0_3 = arith.constant 0 : index
    %c0_4 = arith.constant 0 : index
    %3 = vector.load %arg3[%c0_3, %c0_4] : memref<1x128xf32, #tpu.memory_space<vmem>>, vector<1x128xf32>
    %4 = vector.broadcast %3 : vector<1x128xf32> to vector<8x128xf32>
    %5 = arith.addf %2, %4 : vector<8x128xf32>
    %6 = vector.extract_strided_slice %5 {offsets = [0, 0], sizes = [8, 64], strides = [1, 1]} : vector<8x128xf32> to vector<8x64xf32>
    %7 = math.tanh %6 : vector<8x64xf32>
    %8 = vector.extract_strided_slice %5 {offsets = [0, 64], sizes = [8, 64], strides = [1, 1]} : vector<8x128xf32> to vector<8x64xf32>
    %9 = arith.negf %8 : vector<8x64xf32>
    %10 = math.exp %9 : vector<8x64xf32>
    %cst_5 = arith.constant 1.000000e+00 : f32
    %11 = vector.broadcast %cst_5 : f32 to vector<8x64xf32>
    %12 = arith.addf %11, %10 : vector<8x64xf32>
    %13 = arith.divf %11, %12 : vector<8x64xf32>
    %14 = arith.mulf %7, %13 : vector<8x64xf32>
    %c0_6 = arith.constant 0 : index
    %c0_7 = arith.constant 0 : index
    %15 = vector.load %arg4[%c0_6, %c0_7] : memref<64x128xf32, #tpu.memory_space<vmem>>, vector<64x128xf32>
    %cst_8 = arith.constant dense<0.000000e+00> : vector<8x128xf32>
    %16 = tpu.matmul %14, %15, %cst_8 {dimension_numbers = #tpu.dot_dimension_numbers<[1], [0], [0], [1], [0, 0, 1, 1], [], []>} : vector<8x64xf32>, vector<64x128xf32>, vector<8x128xf32> -> vector<8x128xf32>
    %c0_9 = arith.constant 0 : index
    %c0_10 = arith.constant 0 : index
    %17 = vector.load %arg7[%c0_9, %c0_10] : memref<4x128xf32, #tpu.memory_space<vmem>>, vector<1x128xf32>
    %18 = vector.broadcast %17 : vector<1x128xf32> to vector<8x128xf32>
    %19 = arith.addf %16, %18 : vector<8x128xf32>
    %cst_11 = arith.constant 0.000000e+00 : f32
    %20 = vector.broadcast %cst_11 : f32 to vector<8x128xf32>
    %21 = arith.maximumf %19, %20 : vector<8x128xf32>
    %c0_12 = arith.constant 0 : index
    %c0_13 = arith.constant 0 : index
    %c0_14 = arith.constant 0 : index
    %22 = vector.load %arg5[%c0_12, %c0_13, %c0_14] : memref<2x128x128xf32, #tpu.memory_space<vmem>>, vector<1x128x128xf32>
    %23 = vector.shape_cast %22 : vector<1x128x128xf32> to vector<128x128xf32>
    %cst_15 = arith.constant dense<0.000000e+00> : vector<8x128xf32>
    %24 = tpu.matmul %21, %23, %cst_15 {dimension_numbers = #tpu.dot_dimension_numbers<[1], [0], [0], [1], [0, 0, 1, 1], [], []>} : vector<8x128xf32>, vector<128x128xf32>, vector<8x128xf32> -> vector<8x128xf32>
    %c1 = arith.constant 1 : index
    %c0_16 = arith.constant 0 : index
    %25 = vector.load %arg7[%c1, %c0_16] : memref<4x128xf32, #tpu.memory_space<vmem>>, vector<1x128xf32>
    %26 = vector.broadcast %25 : vector<1x128xf32> to vector<8x128xf32>
    %27 = arith.addf %24, %26 : vector<8x128xf32>
    %cst_17 = arith.constant 0.000000e+00 : f32
    %28 = vector.broadcast %cst_17 : f32 to vector<8x128xf32>
    %29 = arith.maximumf %27, %28 : vector<8x128xf32>
    %c1_18 = arith.constant 1 : index
    %c0_19 = arith.constant 0 : index
    %c0_20 = arith.constant 0 : index
    %30 = vector.load %arg5[%c1_18, %c0_19, %c0_20] : memref<2x128x128xf32, #tpu.memory_space<vmem>>, vector<1x128x128xf32>
    %31 = vector.shape_cast %30 : vector<1x128x128xf32> to vector<128x128xf32>
    %cst_21 = arith.constant dense<0.000000e+00> : vector<8x128xf32>
    %32 = tpu.matmul %29, %31, %cst_21 {dimension_numbers = #tpu.dot_dimension_numbers<[1], [0], [0], [1], [0, 0, 1, 1], [], []>} : vector<8x128xf32>, vector<128x128xf32>, vector<8x128xf32> -> vector<8x128xf32>
    %c2 = arith.constant 2 : index
    %c0_22 = arith.constant 0 : index
    %33 = vector.load %arg7[%c2, %c0_22] : memref<4x128xf32, #tpu.memory_space<vmem>>, vector<1x128xf32>
    %34 = vector.broadcast %33 : vector<1x128xf32> to vector<8x128xf32>
    %35 = arith.addf %32, %34 : vector<8x128xf32>
    %cst_23 = arith.constant 0.000000e+00 : f32
    %36 = vector.broadcast %cst_23 : f32 to vector<8x128xf32>
    %37 = arith.maximumf %35, %36 : vector<8x128xf32>
    %c0_24 = arith.constant 0 : index
    %c0_25 = arith.constant 0 : index
    %38 = vector.load %arg6[%c0_24, %c0_25] : memref<128x128xf32, #tpu.memory_space<vmem>>, vector<128x128xf32>
    %cst_26 = arith.constant dense<0.000000e+00> : vector<8x128xf32>
    %39 = tpu.matmul %37, %38, %cst_26 {dimension_numbers = #tpu.dot_dimension_numbers<[1], [0], [0], [1], [0, 0, 1, 1], [], []>} : vector<8x128xf32>, vector<128x128xf32>, vector<8x128xf32> -> vector<8x128xf32>
    %c3 = arith.constant 3 : index
    %c0_27 = arith.constant 0 : index
    %40 = vector.load %arg7[%c3, %c0_27] : memref<4x128xf32, #tpu.memory_space<vmem>>, vector<1x128xf32>
    %41 = vector.broadcast %40 : vector<1x128xf32> to vector<8x128xf32>
    %42 = arith.addf %39, %41 : vector<8x128xf32>
    %c0_28 = arith.constant 0 : index
    %c0_29 = arith.constant 0 : index
    %43 = vector.load %arg8[%c0_28, %c0_29] : memref<8x128xf32, #tpu.memory_space<vmem>>, vector<8x128xf32>
    tpu.vector_store %arg8[%c0_28, %c0_29], %42 {strides = array<i32>} : memref<8x128xf32, #tpu.memory_space<vmem>>, vector<8x128xf32>,
    return
  }
  func.func @transform_0(%arg0: i32) -> (i32, i32) {
    %c0_i32 = arith.constant 0 : i32
    %c0_i32_0 = arith.constant 0 : i32
    return %arg0, %c0_i32 : i32, i32
  }
  func.func @transform_1(%arg0: i32) -> (i32, i32) {
    %c0_i32 = arith.constant 0 : i32
    %c0_i32_0 = arith.constant 0 : i32
    %c0_i32_1 = arith.constant 0 : i32
    return %c0_i32, %c0_i32_0 : i32, i32
  }
  func.func @transform_2(%arg0: i32) -> (i32, i32) {
    %c0_i32 = arith.constant 0 : i32
    %c0_i32_0 = arith.constant 0 : i32
    %c0_i32_1 = arith.constant 0 : i32
    return %c0_i32, %c0_i32_0 : i32, i32
  }
  func.func @transform_3(%arg0: i32) -> (i32, i32) {
    %c0_i32 = arith.constant 0 : i32
    %c0_i32_0 = arith.constant 0 : i32
    %c0_i32_1 = arith.constant 0 : i32
    return %c0_i32, %c0_i32_0 : i32, i32
  }
  func.func @transform_4(%arg0: i32) -> (i32, i32, i32) {
    %c0_i32 = arith.constant 0 : i32
    %c0_i32_0 = arith.constant 0 : i32
    %c0_i32_1 = arith.constant 0 : i32
    %c0_i32_2 = arith.constant 0 : i32
    return %c0_i32, %c0_i32_0, %c0_i32_1 : i32, i32, i32
  }
  func.func @transform_5(%arg0: i32) -> (i32, i32) {
    %c0_i32 = arith.constant 0 : i32
    %c0_i32_0 = arith.constant 0 : i32
    %c0_i32_1 = arith.constant 0 : i32
    return %c0_i32, %c0_i32_0 : i32, i32
  }
  func.func @transform_6(%arg0: i32) -> (i32, i32) {
    %c0_i32 = arith.constant 0 : i32
    %c0_i32_0 = arith.constant 0 : i32
    %c0_i32_1 = arith.constant 0 : i32
    return %c0_i32, %c0_i32_0 : i32, i32
  }
  func.func @transform_7(%arg0: i32) -> (i32, i32) {
    %c0_i32 = arith.constant 0 : i32
    %c0_i32_0 = arith.constant 0 : i32
    return %arg0, %c0_i32 : i32, i32
  }
}

</mosaic_0001>

<bundles_post_ra>
// kernel: tpu_custom_call.1
= control target key start
LH: loop header
LB: loop body
LE: loop exit
PB: predicated region body
PF: predicated region fallthrough
CT: control target
= control target key end

     0   :  { %12 = vsyncpa [#allocation3], 0  ;;  %s585_s0 = inlined_call_operand.hbm [shape: f32[8,8], index: 0, kind: input, shape index: {}]   ;;  %s586_s1 = inlined_call_operand.hbm [shape: f32[8,128], index: 1, kind: input, shape index: {}]   ;;  %s587_s2 = inlined_call_operand.vmem [shape: f32[1,128], index: 2, kind: input, shape index: {}]   ;;  %s588_s3 = inlined_call_operand.hbm [shape: f32[64,128], index: 3, kind: input, shape index: {}]   ;;  %s589_s4 = inlined_call_operand.hbm [shape: f32[2,128,128], index: 4, kind: input, shape index: {}]   ;;  %s590_s5 = inlined_call_operand.hbm [shape: f32[128,128], index: 5, kind: input, shape index: {}]   ;;  %s591_s6 = inlined_call_operand.vmem [shape: f32[4,128], index: 6, kind: input, shape index: {}]   ;;  %s592_s7 = inlined_call_operand.hbm [shape: f32[8,128], index: 7, kind: output, shape index: {}]  }
   0x1   :  { %13 = vsyncpa [#allocation6], 0 }
   0x2   :  { %14 = vsyncpa [#allocation9], 0  ;;  %s32_s26 = sshll.u32 %s586_s1, 4  ;;  %s33_s26 = int_to_ptr.hbm [resolvable:$true] %s32_s26 }
   0x3   :  { %15 = vsyncpa [#allocation4], 0  ;;  %s503_s27 = smov [#allocation5]   ;;  %s57_s8 = sshll.u32 %s589_s4, 4  ;;  %s58_s8 = int_to_ptr.hbm [resolvable:$true] %s57_s8 }
   0x4   :  { %s34_s28 = sshll.u32 %s503_s27, 4  ;;  %s504_s9 = smov [#allocation8]   ;;  %s35_s28 = int_to_ptr.vmem [resolvable:$true] %s34_s28 }
   0x5   :  { %37 = dma.hbm_to_vmem [thread:$0]  %s33_s26, 128, %s35_s28, [#allocation6]  }
   0x6   :  { %s59_s10 = sshll.u32 %s504_s9, 4  ;;  %s21_s13 = sshll.u32 %s585_s0, 4  ;;  %s60_s10 = int_to_ptr.vmem [resolvable:$true] %s59_s10  ;;  %s22_s13 = int_to_ptr.hbm [resolvable:$true] %s21_s13 }
   0x7   :  { %s505_s1 = smov 128   ;;  %s506_s14 = smov 8  }
   0x8   :  { %65 = dma.hbm_to_vmem [thread:$0]  %s58_s8, 4096, %s60_s10, [#allocation9], %s505_s1, %s505_s1, %s506_s14  }
   0x9   :  { %s44_s17 = sshll.u32 %s588_s3, 4  ;;  %s507_s18 = smov [#allocation2]   ;;  %s45_s17 = int_to_ptr.hbm [resolvable:$true] %s44_s17 }
   0xa   :  { %s23_s19 = sshll.u32 %s507_s18, 4  ;;  %s508_s4 = smov [#allocation7]   ;;  %s24_s19 = int_to_ptr.vmem [resolvable:$true] %s23_s19 }
   0xb   :  { %26 = dma.hbm_to_vmem [thread:$0]  %s22_s13, 128, %s24_s19, [#allocation3]  }
   0xc   :  { %s46_s20 = sshll.u32 %s508_s4, 4  ;;  %s70_s0 = sshll.u32 %s590_s5, 4  ;;  %s47_s20 = int_to_ptr.vmem [resolvable:$true] %s46_s20  ;;  %s71_s0 = int_to_ptr.hbm [resolvable:$true] %s70_s0 }
   0xd   :  { %52 = dma.hbm_to_vmem [thread:$0]  %s45_s17, 1024, %s47_s20, [#allocation6], %s505_s1, %s505_s1, %s506_s14  }
   0xe   :  { %s509_s23 = smov [#allocation10]  }
   0xf   :  { %s72_s24 = sshll.u32 %s509_s23, 4  ;;  %s73_s24 = int_to_ptr.vmem [resolvable:$true] %s72_s24 }
  0x10   :  { %78 = dma.hbm_to_vmem [thread:$0]  %s71_s0, 2048, %s73_s24, [#allocation9], %s505_s1, %s505_s1, %s506_s14  }
  0x11   :  { %495 = dma.done.wait [#allocation3], 128  }
  0x12   :  { %496 = vsyncadd [#allocation3], 4294967168 }
  0x13   :  { %497 = dma.done.wait [#allocation6], 1152  }
  0x14   :  { %498 = vsyncadd [#allocation6], 4294966144 }
  0x15   :  { %499 = dma.done.wait [#allocation9], 6144  }
  0x16   :  { %500 = vsyncadd [#allocation9], 4294961152  ;;  %vm107_vm0 = vcmask 64512   ;;  %v102_v0 = vld [vmem:[#allocation5] sm:$0xff]  ;;  %v101_v1 = vld [vmem:[#allocation2] sm:$0xff]  ;;  %vm166_vm5 = vcmask 523264  }
  0x17   :  { %126 = vmatpush.msra.mxu1 %v102_v0  ;;  %v340_v2 = vld [vmem:[%s587_s2] ss:$0 sm:$0xff]  ;;  %v163_v3 = vld [vmem:[#allocation7 + $0x38] sm:$0xff]  ;;  %v161_v7 = vld [vmem:[#allocation7 + $0x28] sm:$0xff]  ;;  %s510_s2 = smov 64   ;;  %s511_s10 = smov [#allocation11]  }
  0x18   :  { %328 = vmatmul.msk.f32.vlgmr.msra.gmra.mxu1 %vm107_vm0, %v101_v1  ;;  %v162_v4 = vld [vmem:[#allocation7 + $0x30] sm:$0xff]  ;;  %v160_v9 = vld [vmem:[#allocation7 + $0x20] sm:$0xff]  ;;  %v159_v10 = vld [vmem:[#allocation7 + $0x18] sm:$0xff]  ;;  %s314_s11 = sshll.u32 %s511_s10, 4  ;;  %s316_s1 = sshll.u32 %s592_s7, 4  ;;  %s315_s11 = int_to_ptr.vmem [resolvable:$true] %s314_s11  ;;  %s317_s1 = int_to_ptr.hbm [resolvable:$true] %s316_s1 }
  0x19   :  { %178 = vmatpush.msrb.mxu1 %v163_v3  ;;  %v158_v11 = vld [vmem:[#allocation7 + $0x10] sm:$0xff]  ;;  %v157_v24 = vld [vmem:[#allocation7 + $0x8] sm:$0xff]  ;;  %v156_v25 = vld [vmem:[#allocation7] sm:$0xff] }
  0x1a   :  { %v206_v26 = vld [vmem:[#allocation8 + $0x78] sm:$0xff]  ;;  %v205_v27 = vld [vmem:[#allocation8 + $0x70] sm:$0xff]  ;;  %v204_v28 = vld [vmem:[#allocation8 + $0x68] sm:$0xff] }
  0x1b   :  { %179 = vmatpush.msrb.mxu1 %v162_v4  ;;  %209 = vmatpush.msra.mxu2 %v206_v26  ;;  %v203_v29 = vld [vmem:[#allocation8 + $0x60] sm:$0xff]  ;;  %v202_v30 = vld [vmem:[#allocation8 + $0x58] sm:$0xff]  ;;  %v201_v31 = vld [vmem:[#allocation8 + $0x50] sm:$0xff] }
  0x1c   :  { %v200_v32 = vld [vmem:[#allocation8 + $0x48] sm:$0xff]  ;;  %v199_v33 = vld [vmem:[#allocation8 + $0x40] sm:$0xff]  ;;  %v198_v34 = vld [vmem:[#allocation8 + $0x38] sm:$0xff] }
  0x1d   :  { %180 = vmatpush.msrb.mxu1 %v161_v7  ;;  %210 = vmatpush.msra.mxu2 %v205_v27  ;;  %v197_v35 = vld [vmem:[#allocation8 + $0x30] sm:$0xff]  ;;  %v196_v36 = vld [vmem:[#allocation8 + $0x28] sm:$0xff]  ;;  %v195_v37 = vld [vmem:[#allocation8 + $0x20] sm:$0xff] }
  0x1e   :  { %v194_v38 = vld [vmem:[#allocation8 + $0x18] sm:$0xff]  ;;  %v193_v42 = vld [vmem:[#allocation8 + $0x10] sm:$0xff]  ;;  %v192_v43 = vld [vmem:[#allocation8 + $0x8] sm:$0xff] }
  0x1f   :  { %181 = vmatpush.msrb.mxu1 %v160_v9  ;;  %211 = vmatpush.msra.mxu2 %v204_v28  ;;  %v191_v44 = vld [vmem:[#allocation8] sm:$0xff]  ;;  %v246_v45 = vld [vmem:[#allocation8 + $0xf8] sm:$0xff]  ;;  %v245_v46 = vld [vmem:[#allocation8 + $0xf0] sm:$0xff] }
  0x20   :  { %249 = vmatpush.msra.mxu3 %v246_v45  ;;  %v244_v47 = vld [vmem:[#allocation8 + $0xe8] sm:$0xff]  ;;  %v243_v48 = vld [vmem:[#allocation8 + $0xe0] sm:$0xff]  ;;  %v242_v49 = vld [vmem:[#allocation8 + $0xd8] sm:$0xff] }
  0x21   :  { %182 = vmatpush.msrb.mxu1 %v159_v10  ;;  %212 = vmatpush.msra.mxu2 %v203_v29  ;;  %v241_v50 = vld [vmem:[#allocation8 + $0xd0] sm:$0xff]  ;;  %v240_v51 = vld [vmem:[#allocation8 + $0xc8] sm:$0xff]  ;;  %v239_v52 = vld [vmem:[#allocation8 + $0xc0] sm:$0xff] }
  0x22   :  { %250 = vmatpush.msra.mxu3 %v245_v46  ;;  %v238_v53 = vld [vmem:[#allocation8 + $0xb8] sm:$0xff]  ;;  %v237_v54 = vld [vmem:[#allocation8 + $0xb0] sm:$0xff]  ;;  %v236_v55 = vld [vmem:[#allocation8 + $0xa8] sm:$0xff] }
  0x23   :  { %183 = vmatpush.msrb.mxu1 %v158_v11  ;;  %213 = vmatpush.msra.mxu2 %v202_v30  ;;  %v235_v56 = vld [vmem:[#allocation8 + $0xa0] sm:$0xff]  ;;  %v234_v57 = vld [vmem:[#allocation8 + $0x98] sm:$0xff]  ;;  %v341_v58 = vld [vmem:[%s591_s6] ss:$0 sm:$0xff] }
  0x24   :  { %251 = vmatpush.msra.mxu3 %v244_v47  ;;  %v233_v62 = vld [vmem:[#allocation8 + $0x90] sm:$0xff]  ;;  %v232_v63 = vld [vmem:[#allocation8 + $0x88] sm:$0xff]  ;;  %v231_v0 = vld [vmem:[#allocation8 + $0x80] sm:$0xff] }
  0x25   :  { %184 = vmatpush.msrb.mxu1 %v157_v24  ;;  %214 = vmatpush.msra.mxu2 %v201_v31  ;;  %v285_v1 = vld [vmem:[#allocation10 + $0x78] sm:$0xff]  ;;  %v283_v3 = vld [vmem:[#allocation10 + $0x68] sm:$0xff]  ;;  %v282_v4 = vld [vmem:[#allocation10 + $0x60] sm:$0xff] }
  0x26   :  { %252 = vmatpush.msra.mxu3 %v243_v48  ;;  %288 = vmatpush.msra.mxu0 %v285_v1  ;;  %v279_v7 = vld [vmem:[#allocation10 + $0x48] sm:$0xff]  ;;  %v277_v9 = vld [vmem:[#allocation10 + $0x38] sm:$0xff]  ;;  %v276_v10 = vld [vmem:[#allocation10 + $0x30] sm:$0xff] }
  0x27   :  { %185 = vmatpush.msrb.mxu1 %v156_v25  ;;  %215 = vmatpush.msra.mxu2 %v200_v32  ;;  %v275_v11 = vld [vmem:[#allocation10 + $0x28] sm:$0xff]  ;;  %v344_v25 = vld [vmem:[%s591_s6 + $0x3] ss:$0 sm:$0xff] }
  0x28   :  { %253 = vmatpush.msra.mxu3 %v242_v49 }
  0x29   :  { %216 = vmatpush.msra.mxu2 %v199_v33 }
  0x2a   :  { %254 = vmatpush.msra.mxu3 %v241_v50 }
  0x2b   :  { %217 = vmatpush.msra.mxu2 %v198_v34 }
  0x2c   :  { %255 = vmatpush.msra.mxu3 %v240_v51 }
  0x2d   :  { %218 = vmatpush.msra.mxu2 %v197_v35 }
  0x2e   :  { %256 = vmatpush.msra.mxu3 %v239_v52 }
  0x2f   :  { %219 = vmatpush.msra.mxu2 %v196_v36 }
  0x30   :  { %257 = vmatpush.msra.mxu3 %v238_v53 }
  0x31   :  { %220 = vmatpush.msra.mxu2 %v195_v37 }
  0x32   :  { %258 = vmatpush.msra.mxu3 %v237_v54 }
  0x33   :  { %221 = vmatpush.msra.mxu2 %v194_v38 }
  0x34   :  { %259 = vmatpush.msra.mxu3 %v236_v55 }
  0x35   :  { %222 = vmatpush.msra.mxu2 %v193_v42 }
  0x36   :  { %260 = vmatpush.msra.mxu3 %v235_v56 }
  0x37   :  { %223 = vmatpush.msra.mxu2 %v192_v43 }
  0x38   :  { %261 = vmatpush.msra.mxu3 %v234_v57 }
  0x39   :  { %224 = vmatpush.msra.mxu2 %v191_v44 }
  0x3a   :  { %262 = vmatpush.msra.mxu3 %v233_v62 }
  0x3c   :  { %263 = vmatpush.msra.mxu3 %v232_v63 }
  0x3e   :  { %264 = vmatpush.msra.mxu3 %v231_v0 }
  0x95   :  { %v128_v5 = vpop.f32.mrf.mxu1 }
  0x96   :  { %v129_v6 = vadd.f32 %v340_v2, %v128_v5  ;;  %v284_v2 = vld [vmem:[#allocation10 + $0x70] sm:$0xff]  ;;  %v281_v5 = vld [vmem:[#allocation10 + $0x58] sm:$0xff] }
  0x97   :  { %289 = vmatpush.msra.mxu0 %v284_v2 }
  0x98   :  { %v329_v8 = vmul.f32 -1.442695, %v129_v6 }
  0x99   :  { %290 = vmatpush.msra.mxu0 %v283_v3 }
  0x9a   :  { %345 = vpow2.f32 %v329_v8  ;;  %v278_v8 = vld [vmem:[#allocation10 + $0x40] sm:$0xff] }
  0x9b   :  { %291 = vmatpush.msra.mxu0 %v282_v4 }
  0x9d   :  { %292 = vmatpush.msra.mxu0 %v281_v5 }
  0xa0   :  { %v346_v12 = vpop.eup %345 }
  0xa1   :  { %v135_v13 = vadd.f32 1.0, %v346_v12  ;;  %v274_v12 = vld [vmem:[#allocation10 + $0x20] sm:$0xff] }
  0xa3   :  { %347 = vrcp.f32 %v135_v13  ;;  %v147_v17 = vand.u32 2147483648, %v135_v13  ;;  %v145_v19 = vand.u32 2147483647, %v135_v13  ;;  %vm141_vm2 = vweird.f32 %v135_v13 }
  0xa4   :  { %349 = vtanh.f32 %v129_v6  ;;  %v280_v6 = vld [vmem:[#allocation10 + $0x50] sm:$0xff] }
  0xa5   :  { %v148_v21 = vor.u32 1.1754944e-38, %v147_v17  ;;  %vm146_vm4 = vcmp.eq.f32.partialorder %v145_v19, 8.507059e+37  ;;  %293 = vmatpush.msra.mxu0 %v280_v6  ;;  %v271_v19 = vld [vmem:[#allocation10 + $0x8] sm:$0xff] }
  0xa7   :  { %294 = vmatpush.msra.mxu0 %v279_v7 }
  0xa9   :  { %v348_v14 = vpop.eup %347  ;;  %295 = vmatpush.msra.mxu0 %v278_v8 }
  0xaa   :  { %v137_v15 = vmul.f32 %v348_v14, %v135_v13  ;;  %vm142_vm1 = vweird.f32 %v348_v14  ;;  %v350_v39 = vpop.eup %349  ;;  %v273_v13 = vld [vmem:[#allocation10 + $0x18] sm:$0xff] }
  0xab   :  { %vm143_vm3 = vmor %vm141_vm2, %vm142_vm1  ;;  %296 = vmatpush.msra.mxu0 %v277_v9 }
  0xac   :  { %v138_v16 = vsub.f32 1.0, %v137_v15 }
  0xad   :  { %297 = vmatpush.msra.mxu0 %v276_v10 }
  0xae   :  { %v139_v18 = vmul.f32 %v348_v14, %v138_v16 }
  0xaf   :  { %298 = vmatpush.msra.mxu0 %v275_v11 }
  0xb0   :  { %v140_v20 = vadd.f32 %v348_v14, %v139_v18  ;;  %v272_v18 = vld [vmem:[#allocation10 + $0x10] sm:$0xff] }
  0xb1   :  { %299 = vmatpush.msra.mxu0 %v274_v12 }
  0xb2   :  { %v144_v22 = vsel %vm143_vm3, %v348_v14, %v140_v20  ;;  %v342_v14 = vld [vmem:[%s591_s6 + $0x1] ss:$0 sm:$0xff]  ;;  %v270_v20 = vld [vmem:[#allocation10] sm:$0xff] }
  0xb3   :  { %v149_v23 = vsel %vm146_vm4, %v148_v21, %v144_v22  ;;  %300 = vmatpush.msra.mxu0 %v273_v13  ;;  %v343_v21 = vld [vmem:[%s591_s6 + $0x2] ss:$0 sm:$0xff] }
  0xb4   :  { %152 = vrot.lane.b32.xlu0 %v149_v23, %s510_s2 }
  0xb5   :  { %301 = vmatpush.msra.mxu0 %v272_v18 }
  0xb7   :  { %302 = vmatpush.msra.mxu0 %v271_v19 }
  0xb9   :  { %303 = vmatpush.msra.mxu0 %v270_v20 }
 0x126   :  { %v153_v40 = vpop.permute.xlu0 %152 }
 0x127   :  { %v155_v41 = vmul.f32 %v350_v39, %v153_v40 }
 0x129   :  { %330 = vmatmul.msk.f32.vlgmr.msrb.gmra.mxu1 %vm166_vm5, %v155_v41 }
 0x1a6   :  { %v187_v59 = vpop.f32.mrf.mxu1 }
 0x1a7   :  { %v188_v60 = vadd.f32 %v341_v58, %v187_v59 }
 0x1a9   :  { %v190_v61 = vmax.f32 %v188_v60, 0.0 }
 0x1ab   :  { %225 = vmatmul.f32.vlgmr.msra.gmra.mxu2 %v190_v61 }
 0x22e   :  { %v226_v15 = vpop.f32.mrf.mxu2 }
 0x22f   :  { %v227_v16 = vadd.f32 %v342_v14, %v226_v15 }
 0x231   :  { %v229_v17 = vmax.f32 %v227_v16, 0.0 }
 0x233   :  { %265 = vmatmul.f32.vlgmr.msra.gmra.mxu3 %v229_v17 }
 0x2b6   :  { %v266_v22 = vpop.f32.mrf.mxu3 }
 0x2b7   :  { %v267_v23 = vadd.f32 %v343_v21, %v266_v22 }
 0x2b9   :  { %v269_v24 = vmax.f32 %v267_v23, 0.0 }
 0x2bb   :  { %304 = vmatmul.f32.vlgmr.msra.gmra.mxu0 %v269_v24 }
 0x338   :  { %v305_v26 = vpop.f32.mrf.mxu0 }
 0x339   :  { %v306_v27 = vadd.f32 %v344_v25, %v305_v26 }
 0x33b   :  { %308 = vst [vmem:[#allocation11] sm:$0xff] %v306_v27 }
 0x33c   :  { %319 = dma.vmem_to_hbm [thread:$0]  %s315_s11, 128, %s317_s1, [#allocation4]  }
 0x33d   :  { %501 = dma.done.wait [#allocation4], 128  }
 0x33e   :  { %502 = vsyncadd [#allocation4], 4294967168 }
 0x33f   :  { %324 = vsyncpa [#allocation3], 1 }
 0x340   :  { %325 = vsyncpa [#allocation6], 1 }
 0x341   :  { %326 = vsyncpa [#allocation9], 1 }
 0x342   :  { %327 = vsyncpa [#allocation4], 1 }

</bundles_post_ra>
